<compile_context>
chip_gen: v5e
topology: v5e:2x2
jax: 0.10.0
libtpu: 0.0.40
codegen_flags: <defaults>
</compile_context>

<pallas_src>
import functools

import jax
import jax.numpy as jnp
from jax import lax
from jax.experimental import pallas as pl
from jax.experimental.pallas import tpu as pltpu

H1 = 100          # first hidden width (PyTorch)
H2 = 10           # embedding width (PyTorch)
H_PAD = 128       # lane-padded hidden width
OUT_COL = H2      # column of the output slab that carries the final scalar


def _round_up(n, m):
    return ((n + m - 1) // m) * m


def _pad2d(a, rows, cols):
    r, c = a.shape
    return jnp.pad(a, ((0, rows - r), (0, cols - c)))


# ----------------------------- Pallas kernel ------------------------------ #
def _backbone_kernel(x_ref, w1_ref, b1_ref, w2_ref, b2_ref, w3_ref, b3_ref,
                     *rest, training):
    if training:
        mask_ref, slab_ref = rest
    else:
        (slab_ref,) = rest

    x = x_ref[...]                                                    # (TB, D)

    # phi[0]: Linear(input_dim, 100->128 padded) + ReLU   (MXU)
    h = jnp.dot(x, w1_ref[...], preferred_element_type=jnp.float32) + b1_ref[...]
    h = jnp.maximum(h, 0.0)                                           # (TB, 128)

    # phi[2]: Linear(100, 10) -> embedded_x (cols 10..127 are exactly zero)
    e = jnp.dot(h, w2_ref[...], preferred_element_type=jnp.float32) + b2_ref[...]

    # hypothesis: Dropout (training only, inverted scaling baked into mask)
    e_d = e * mask_ref[...] if training else e

    # hypothesis: Linear(10, 1) on the VPU/XLU: broadcast-mul + lane reduce.
    out = jnp.sum(e_d * w3_ref[...], axis=-1, keepdims=True) + b3_ref[...]  # (TB,1)

    # Single lane-dense store: cols 0..9 = embedded_x, col OUT_COL = output.
    col = lax.broadcasted_iota(jnp.int32, e.shape, 1)
    slab_ref[...] = jnp.where(col == OUT_COL, out, e)


# ------------------------------- wrapper ----------------------------------- #
def citycam_backbone_forward(x, params, *, dof=0.5, training=False, seed=0):
    """Fused CityCamBackbone forward on TPU via Pallas.

    x: (batch, input_dim) float32
    params: w1 (D,100), b1 (1,100), w2 (100,10), b2 (1,10), w3 (10,1), b3 (1,1)
    """
    batch, in_dim = x.shape

    # --- batch tiling: TB <= 512, multiple of 8; pad batch to a TB multiple --
    tb = min(512, _round_up(batch, 8))
    padded_b = _round_up(batch, tb)
    if padded_b != batch:
        x = jnp.pad(x, ((0, padded_b - batch), (0, 0)))
    grid = (padded_b // tb,)

    # --- lane-pad parameters (zero padding: numerically exact) ---------------
    w1 = _pad2d(params["w1"], in_dim, H_PAD)          # (D, 128)
    b1 = _pad2d(params["b1"], 1, H_PAD)               # (1, 128)
    w2 = _pad2d(params["w2"], H_PAD, H_PAD)           # (128, 128)
    b2 = _pad2d(params["b2"], 1, H_PAD)               # (1, 128)
    w3 = _pad2d(params["w3"].T, 1, H_PAD)             # (1, 128) row vector
    b3 = params["b3"].reshape(1, 1)                   # (1, 1)

    row = lambda i: (i, 0)        # tiled over batch
    const = lambda i: (0, 0)      # resident in VMEM across grid steps

    in_arrays = [x, w1, b1, w2, b2, w3, b3]
    in_specs = [
        pl.BlockSpec((tb, in_dim), row),
        pl.BlockSpec((in_dim, H_PAD), const),
        pl.BlockSpec((1, H_PAD), const),
        pl.BlockSpec((H_PAD, H_PAD), const),
        pl.BlockSpec((1, H_PAD), const),
        pl.BlockSpec((1, H_PAD), const),
        pl.BlockSpec((1, 1), const),
    ]

    if training:
        keep_prob = 1.0 - dof
        u = jax.random.uniform(jax.random.PRNGKey(seed), (padded_b, H_PAD),
                               dtype=jnp.float32)
        mask = jnp.where(u < keep_prob, 1.0 / keep_prob, 0.0).astype(jnp.float32)
        in_arrays.append(mask)
        in_specs.append(pl.BlockSpec((tb, H_PAD), row))

    kernel = functools.partial(_backbone_kernel, training=training)

    slab = pl.pallas_call(
        kernel,
        out_shape=jax.ShapeDtypeStruct((padded_b, H_PAD), jnp.float32),
        grid=grid,
        in_specs=in_specs,
        out_specs=pl.BlockSpec((tb, H_PAD), row),
        compiler_params=pltpu.CompilerParams(
            dimension_semantics=("parallel",),       # shards batch on v7x's 2 TCs
            vmem_limit_bytes=32 * 1024 * 1024,       # fits v7x scoped VMEM
        ),
    )(*in_arrays)

    outputs = slab[:batch, OUT_COL:OUT_COL + 1]       # (batch, 1)
    if training:
        embedded = slab[:batch, :H2]                  # (batch, 10), pre-dropout
        return outputs, embedded
    return outputs


# --------------------------- parameter creation ---------------------------- #
def init_params(input_dim, key):
    """Deterministic synthetic init, PyTorch-Linear-style uniform bounds."""
    def linear(k, fan_in, fan_out):
        kw, kb = jax.random.split(k)
        bound = 1.0 / jnp.sqrt(fan_in)
        w = jax.random.uniform(kw, (fan_in, fan_out), jnp.float32, -bound, bound)
        b = jax.random.uniform(kb, (1, fan_out), jnp.float32, -bound, bound)
        return w, b

    k1, k2, k3 = jax.random.split(key, 3)
    w1, b1 = linear(k1, input_dim, H1)
    w2, b2 = linear(k2, H1, H2)
    w3, b3 = linear(k3, H2, 1)
    return dict(w1=w1, b1=b1, w2=w2, b2=b2, w3=w3, b3=b3)


def reference_eval(x, p):
    """Pure-JAX reference for the eval-mode forward (dropout = identity)."""
    dot = functools.partial(jnp.dot, precision=lax.Precision.HIGHEST)
    h = jnp.maximum(dot(x, p["w1"]) + p["b1"], 0.0)
    e = dot(h, p["w2"]) + p["b2"]
    return dot(e, p["w3"]) + p["b3"], e


# ---------------------------------- main ----------------------------------- #
if __name__ == "__main__":
    batch, input_dim = 8, 32
    key = jax.random.PRNGKey(0)
    kx, kp = jax.random.split(key)

    x = jax.random.normal(kx, (batch, input_dim), dtype=jnp.float32)
    params = init_params(input_dim, kp)
    ref_out, ref_emb = reference_eval(x, params)

    # eval-mode forward (returns outputs only, like PyTorch .eval())
    out = citycam_backbone_forward(x, params, dof=0.5, training=False)
    out = jax.block_until_ready(out)
    assert out.shape == (batch, 1)
    assert jnp.allclose(out, ref_out, atol=1e-4, rtol=1e-4), "eval-mode mismatch"

    # training-mode with dof=0.0: dropout is identity -> must match eval result
    tr_out0, tr_emb0 = citycam_backbone_forward(
        x, params, dof=0.0, training=True, seed=7)
    jax.block_until_ready((tr_out0, tr_emb0))
    assert jnp.allclose(tr_out0, ref_out, atol=1e-4, rtol=1e-4), "train dof=0 mismatch"
    assert jnp.allclose(tr_emb0, ref_emb, atol=1e-4, rtol=1e-4), "embedded mismatch"

    # training-mode with dof=0.5: (outputs, embedded_x); embedded is pre-dropout
    tr_out, tr_emb = citycam_backbone_forward(
        x, params, dof=0.5, training=True, seed=123)
    jax.block_until_ready((tr_out, tr_emb))
    assert tr_out.shape == (batch, 1) and tr_emb.shape == (batch, 10)
    assert jnp.allclose(tr_emb, ref_emb, atol=1e-4, rtol=1e-4), "embedded mismatch"

    print("KERNEL_OK")
</pallas_src>

<mosaic_0001>
module attributes {stable_mosaic.version = 11 : i64} {
  func.func @_backbone_kernel(%arg0: i32, %arg1: memref<8x32xf32, #tpu.memory_space<vmem>>, %arg2: memref<32x128xf32, #tpu.memory_space<vmem>>, %arg3: memref<1x128xf32, #tpu.memory_space<vmem>>, %arg4: memref<128x128xf32, #tpu.memory_space<vmem>>, %arg5: memref<1x128xf32, #tpu.memory_space<vmem>>, %arg6: memref<1x128xf32, #tpu.memory_space<vmem>>, %arg7: memref<1x1xf32, #tpu.memory_space<vmem>>, %arg8: memref<8x128xf32, #tpu.memory_space<vmem>>) attributes {dimension_semantics = [#tpu.dimension_semantics<parallel>], iteration_bounds = array<i64: 1>, scalar_prefetch = 0 : i64, scratch_operands = 0 : i64, tpu.core_type = #tpu.core_type<tc>, window_params = [{transform_indices = @transform_0, window_bounds = array<i64: 8, 32>}, {pipeline_mode = #tpu.pipeline_mode<synchronous>, transform_indices = @transform_1, window_bounds = array<i64: 32, 128>}, {pipeline_mode = #tpu.pipeline_mode<synchronous>, transform_indices = @transform_2, window_bounds = array<i64: 1, 128>}, {pipeline_mode = #tpu.pipeline_mode<synchronous>, transform_indices = @transform_3, window_bounds = array<i64: 128, 128>}, {pipeline_mode = #tpu.pipeline_mode<synchronous>, transform_indices = @transform_4, window_bounds = array<i64: 1, 128>}, {pipeline_mode = #tpu.pipeline_mode<synchronous>, transform_indices = @transform_5, window_bounds = array<i64: 1, 128>}, {pipeline_mode = #tpu.pipeline_mode<synchronous>, transform_indices = @transform_6, window_bounds = array<i64: 1, 1>}, {transform_indices = @transform_7, window_bounds = array<i64: 8, 128>}]} {
    %c0 = arith.constant 0 : index
    %c0_0 = arith.constant 0 : index
    %0 = vector.load %arg1[%c0, %c0_0] : memref<8x32xf32, #tpu.memory_space<vmem>>, vector<8x32xf32>
    %c0_1 = arith.constant 0 : index
    %c0_2 = arith.constant 0 : index
    %1 = vector.load %arg2[%c0_1, %c0_2] : memref<32x128xf32, #tpu.memory_space<vmem>>, vector<32x128xf32>
    %cst = arith.constant dense<0.000000e+00> : vector<8x128xf32>
    %2 = tpu.matmul %0, %1, %cst {dimension_numbers = #tpu.dot_dimension_numbers<[1], [0], [0], [1], [0, 0, 1, 1], [], []>} : vector<8x32xf32>, vector<32x128xf32>, vector<8x128xf32> -> vector<8x128xf32>
    %c0_3 = arith.constant 0 : index
    %c0_4 = arith.constant 0 : index
    %3 = vector.load %arg3[%c0_3, %c0_4] : memref<1x128xf32, #tpu.memory_space<vmem>>, vector<1x128xf32>
    %4 = vector.broadcast %3 : vector<1x128xf32> to vector<8x128xf32>
    %5 = arith.addf %2, %4 : vector<8x128xf32>
    %cst_5 = arith.constant 0.000000e+00 : f32
    %6 = vector.broadcast %cst_5 : f32 to vector<8x128xf32>
    %7 = arith.maximumf %5, %6 : vector<8x128xf32>
    %c0_6 = arith.constant 0 : index
    %c0_7 = arith.constant 0 : index
    %8 = vector.load %arg4[%c0_6, %c0_7] : memref<128x128xf32, #tpu.memory_space<vmem>>, vector<128x128xf32>
    %cst_8 = arith.constant dense<0.000000e+00> : vector<8x128xf32>
    %9 = tpu.matmul %7, %8, %cst_8 {dimension_numbers = #tpu.dot_dimension_numbers<[1], [0], [0], [1], [0, 0, 1, 1], [], []>} : vector<8x128xf32>, vector<128x128xf32>, vector<8x128xf32> -> vector<8x128xf32>
    %c0_9 = arith.constant 0 : index
    %c0_10 = arith.constant 0 : index
    %10 = vector.load %arg5[%c0_9, %c0_10] : memref<1x128xf32, #tpu.memory_space<vmem>>, vector<1x128xf32>
    %11 = vector.broadcast %10 : vector<1x128xf32> to vector<8x128xf32>
    %12 = arith.addf %9, %11 : vector<8x128xf32>
    %c0_11 = arith.constant 0 : index
    %c0_12 = arith.constant 0 : index
    %13 = vector.load %arg6[%c0_11, %c0_12] : memref<1x128xf32, #tpu.memory_space<vmem>>, vector<1x128xf32>
    %14 = vector.broadcast %13 : vector<1x128xf32> to vector<8x128xf32>
    %15 = arith.mulf %12, %14 : vector<8x128xf32>
    %cst_13 = arith.constant dense<0.000000e+00> : vector<8xf32>
    %16 = vector.multi_reduction <add>, %15, %cst_13 [1] : vector<8x128xf32> to vector<8xf32>
    %17 = vector.shape_cast %16 : vector<8xf32> to vector<8x1xf32>
    %c0_14 = arith.constant 0 : index
    %c0_15 = arith.constant 0 : index
    %18 = vector.load %arg7[%c0_14, %c0_15] : memref<1x1xf32, #tpu.memory_space<vmem>>, vector<1x1xf32>
    %19 = vector.broadcast %18 : vector<1x1xf32> to vector<8x1xf32>
    %20 = arith.addf %17, %19 : vector<8x1xf32>
    %21 = tpu.iota {dimensions = array<i32: 1>} : vector<8x128xi32>
    %c10_i32 = arith.constant 10 : i32
    %22 = vector.broadcast %c10_i32 : i32 to vector<8x128xi32>
    %23 = arith.cmpi eq, %21, %22 : vector<8x128xi32>
    %24 = vector.shape_cast %20 : vector<8x1xf32> to vector<8x1xf32>
    %25 = vector.broadcast %24 : vector<8x1xf32> to vector<8x128xf32>
    %26 = arith.select %23, %25, %12 : vector<8x128xi1>, vector<8x128xf32>
    %c0_16 = arith.constant 0 : index
    %c0_17 = arith.constant 0 : index
    %27 = vector.load %arg8[%c0_16, %c0_17] : memref<8x128xf32, #tpu.memory_space<vmem>>, vector<8x128xf32>
    tpu.vector_store %arg8[%c0_16, %c0_17], %26 {strides = array<i32>} : memref<8x128xf32, #tpu.memory_space<vmem>>, vector<8x128xf32>,
    return
  }
  func.func @transform_0(%arg0: i32) -> (i32, i32) {
    %c0_i32 = arith.constant 0 : i32
    %c0_i32_0 = arith.constant 0 : i32
    return %arg0, %c0_i32 : i32, i32
  }
  func.func @transform_1(%arg0: i32) -> (i32, i32) {
    %c0_i32 = arith.constant 0 : i32
    %c0_i32_0 = arith.constant 0 : i32
    %c0_i32_1 = arith.constant 0 : i32
    return %c0_i32, %c0_i32_0 : i32, i32
  }
  func.func @transform_2(%arg0: i32) -> (i32, i32) {
    %c0_i32 = arith.constant 0 : i32
    %c0_i32_0 = arith.constant 0 : i32
    %c0_i32_1 = arith.constant 0 : i32
    return %c0_i32, %c0_i32_0 : i32, i32
  }
  func.func @transform_3(%arg0: i32) -> (i32, i32) {
    %c0_i32 = arith.constant 0 : i32
    %c0_i32_0 = arith.constant 0 : i32
    %c0_i32_1 = arith.constant 0 : i32
    return %c0_i32, %c0_i32_0 : i32, i32
  }
  func.func @transform_4(%arg0: i32) -> (i32, i32) {
    %c0_i32 = arith.constant 0 : i32
    %c0_i32_0 = arith.constant 0 : i32
    %c0_i32_1 = arith.constant 0 : i32
    return %c0_i32, %c0_i32_0 : i32, i32
  }
  func.func @transform_5(%arg0: i32) -> (i32, i32) {
    %c0_i32 = arith.constant 0 : i32
    %c0_i32_0 = arith.constant 0 : i32
    %c0_i32_1 = arith.constant 0 : i32
    return %c0_i32, %c0_i32_0 : i32, i32
  }
  func.func @transform_6(%arg0: i32) -> (i32, i32) {
    %c0_i32 = arith.constant 0 : i32
    %c0_i32_0 = arith.constant 0 : i32
    %c0_i32_1 = arith.constant 0 : i32
    return %c0_i32, %c0_i32_0 : i32, i32
  }
  func.func @transform_7(%arg0: i32) -> (i32, i32) {
    %c0_i32 = arith.constant 0 : i32
    %c0_i32_0 = arith.constant 0 : i32
    return %arg0, %c0_i32 : i32, i32
  }
}

</mosaic_0001>

<bundles_post_ra>
// kernel: tpu_custom_call.1
= control target key start
LH: loop header
LB: loop body
LE: loop exit
PB: predicated region body
PF: predicated region fallthrough
CT: control target
= control target key end

     0   :  { %s374_s0 = inlined_call_operand.hbm [shape: f32[8,32], index: 0, kind: input, shape index: {}]   ;;  %s375_s1 = inlined_call_operand.hbm [shape: f32[32,128], index: 1, kind: input, shape index: {}]   ;;  %s376_s2 = inlined_call_operand.vmem [shape: f32[1,128], index: 2, kind: input, shape index: {}]   ;;  %s377_s3 = inlined_call_operand.hbm [shape: f32[128,128], index: 3, kind: input, shape index: {}]   ;;  %s378_s4 = inlined_call_operand.vmem [shape: f32[1,128], index: 4, kind: input, shape index: {}]   ;;  %s379_s5 = inlined_call_operand.vmem [shape: f32[1,128], index: 5, kind: input, shape index: {}]   ;;  %s380_s6 = inlined_call_operand.<no memory space> [shape: f32[1,1], index: 6, kind: input, shape index: {}]   ;;  %s381_s7 = inlined_call_operand.hbm [shape: f32[8,128], index: 7, kind: output, shape index: {}]  }
   0x1   :  { %v12_v0 = vstv %s380_s6 }
   0x2   :  { %13 = vst [vmem:[#allocation2] sm:$0x1] %v12_v0 }
   0x3   :  { %14 = vsyncpa [#allocation4], 0 }
   0x4   :  { %15 = vsyncpa [#allocation7], 0  ;;  %s32_s28 = sshll.u32 %s375_s1, 4  ;;  %s33_s28 = int_to_ptr.hbm [resolvable:$true] %s32_s28 }
   0x5   :  { %16 = vsyncpa [#allocation5], 0  ;;  %s303_s29 = smov [#allocation6]   ;;  %s22_s10 = sshll.u32 %s374_s0, 4  ;;  %s23_s10 = int_to_ptr.hbm [resolvable:$true] %s22_s10 }
   0x6   :  { %s34_s30 = sshll.u32 %s303_s29, 4  ;;  %s304_s11 = smov 128   ;;  %s35_s30 = int_to_ptr.vmem [resolvable:$true] %s34_s30 }
   0x7   :  { %s305_s12 = smov 8   ;;  %s306_s6 = smov [#allocation3]  }
   0x8   :  { %40 = dma.hbm_to_vmem [thread:$0]  %s33_s28, 512, %s35_s30, [#allocation7], %s304_s11, %s304_s11, %s305_s12  }
   0x9   :  { %s24_s13 = sshll.u32 %s306_s6, 4  ;;  %s47_s16 = sshll.u32 %s377_s3, 4  ;;  %s25_s13 = int_to_ptr.vmem [resolvable:$true] %s24_s13  ;;  %s48_s16 = int_to_ptr.hbm [resolvable:$true] %s47_s16 }
   0xa   :  { %27 = dma.hbm_to_vmem [thread:$0]  %s23_s10, 128, %s25_s13, [#allocation4]  }
   0xb   :  { %s307_s1 = smov [#allocation8]  }
   0xc   :  { %s49_s17 = sshll.u32 %s307_s1, 4  ;;  %s50_s17 = int_to_ptr.vmem [resolvable:$true] %s49_s17 }
   0xd   :  { %55 = dma.hbm_to_vmem [thread:$0]  %s48_s16, 2048, %s50_s17, [#allocation7], %s304_s11, %s304_s11, %s305_s12  }
   0xe   :  { %297 = dma.done.wait [#allocation4], 128  }
   0xf   :  { %298 = vsyncadd [#allocation4], 4294967168 }
  0x10   :  { %299 = dma.done.wait [#allocation7], 2560  }
  0x11   :  { %300 = vsyncadd [#allocation7], 4294964736  ;;  %v78_v1 = vld [vmem:[#allocation6 + $0x18] sm:$0xff]  ;;  %v77_v2 = vld [vmem:[#allocation6 + $0x10] sm:$0xff]  ;;  %vm83_vm0 = vcmask 261120   ;;  %v308_v31 = vmov 0   ;;  %v160_v35 = vlaneseq }
  0x12   :  { %99 = vmatpush.msra.mxu0 %v78_v1  ;;  %v123_v3 = vld [vmem:[#allocation8 + $0x78] sm:$0xff]  ;;  %v76_v4 = vld [vmem:[#allocation6 + $0x8] sm:$0xff]  ;;  %v122_v5 = vld [vmem:[#allocation8 + $0x70] sm:$0xff]  ;;  %196 = vset.pattern.permute.xlu0 %v308_v31  ;;  %s177_s24 = sshll.u32 %s381_s7, 4  ;;  %s178_s24 = int_to_ptr.hbm [resolvable:$true] %s177_s24 }
  0x13   :  { %128 = vmatpush.msra.mxu1 %v123_v3  ;;  %v121_v6 = vld [vmem:[#allocation8 + $0x68] sm:$0xff]  ;;  %v75_v7 = vld [vmem:[#allocation6] sm:$0xff]  ;;  %v74_v8 = vld [vmem:[#allocation3] sm:$0xff]  ;;  %v161_v36 = vand.u32 127, %v160_v35 }
  0x14   :  { %100 = vmatpush.msra.mxu0 %v77_v2  ;;  %v120_v9 = vld [vmem:[#allocation8 + $0x60] sm:$0xff]  ;;  %v119_v10 = vld [vmem:[#allocation8 + $0x58] sm:$0xff]  ;;  %v118_v11 = vld [vmem:[#allocation8 + $0x50] sm:$0xff] }
  0x15   :  { %129 = vmatpush.msra.mxu1 %v122_v5  ;;  %v117_v12 = vld [vmem:[#allocation8 + $0x48] sm:$0xff]  ;;  %v116_v13 = vld [vmem:[#allocation8 + $0x40] sm:$0xff]  ;;  %v115_v14 = vld [vmem:[#allocation8 + $0x38] sm:$0xff]  ;;  %vm162_vm1 = vcmp.eq.s32.totalorder %v161_v36, 10 }
  0x16   :  { %101 = vmatpush.msra.mxu0 %v76_v4  ;;  %v114_v15 = vld [vmem:[#allocation8 + $0x30] sm:$0xff]  ;;  %v113_v16 = vld [vmem:[#allocation8 + $0x28] sm:$0xff]  ;;  %v112_v17 = vld [vmem:[#allocation8 + $0x20] sm:$0xff] }
  0x17   :  { %130 = vmatpush.msra.mxu1 %v121_v6  ;;  %v111_v18 = vld [vmem:[#allocation8 + $0x18] sm:$0xff]  ;;  %v110_v19 = vld [vmem:[#allocation8 + $0x10] sm:$0xff]  ;;  %v109_v20 = vld [vmem:[#allocation8 + $0x8] sm:$0xff] }
  0x18   :  { %102 = vmatpush.msra.mxu0 %v75_v7  ;;  %v108_v21 = vld [vmem:[#allocation8] sm:$0xff]  ;;  %v197_v22 = vld [vmem:[%s376_s2] ss:$0 sm:$0xff]  ;;  %s309_s2 = smov [#allocation9]  }
  0x19   :  { %188 = vmatmul.msk.f32.vlgmr.msra.gmra.mxu0 %vm83_vm0, %v74_v8  ;;  %131 = vmatpush.msra.mxu1 %v120_v9  ;;  %v198_v26 = vld [vmem:[%s378_s4] ss:$0 sm:$0xff]  ;;  %s175_s22 = sshll.u32 %s309_s2, 4  ;;  %s176_s22 = int_to_ptr.vmem [resolvable:$true] %s175_s22 }
  0x1a   :  { %v199_v27 = vld [vmem:[%s379_s5] ss:$0 sm:$0xff] }
  0x1b   :  { %132 = vmatpush.msra.mxu1 %v119_v10  ;;  %v200_v32 = vld [vmem:[#allocation2] ss:$0 sm:$0xff] }
  0x1d   :  { %133 = vmatpush.msra.mxu1 %v118_v11 }
  0x1f   :  { %134 = vmatpush.msra.mxu1 %v117_v12 }
  0x21   :  { %135 = vmatpush.msra.mxu1 %v116_v13 }
  0x23   :  { %136 = vmatpush.msra.mxu1 %v115_v14 }
  0x25   :  { %137 = vmatpush.msra.mxu1 %v114_v15 }
  0x27   :  { %138 = vmatpush.msra.mxu1 %v113_v16 }
  0x29   :  { %139 = vmatpush.msra.mxu1 %v112_v17 }
  0x2b   :  { %140 = vmatpush.msra.mxu1 %v111_v18 }
  0x2d   :  { %141 = vmatpush.msra.mxu1 %v110_v19 }
  0x2f   :  { %142 = vmatpush.msra.mxu1 %v109_v20 }
  0x31   :  { %143 = vmatpush.msra.mxu1 %v108_v21 }
  0x96   :  { %v104_v23 = vpop.f32.mrf.mxu0 }
  0x97   :  { %v105_v24 = vadd.f32 %v197_v22, %v104_v23 }
  0x99   :  { %v107_v25 = vmax.f32 %v105_v24, 0.0 }
  0x9b   :  { %144 = vmatmul.f32.vlgmr.msra.gmra.mxu1 %v107_v25 }
 0x118   :  { %v145_v28 = vpop.f32.mrf.mxu1 }
 0x119   :  { %v146_v29 = vadd.f32 %v198_v26, %v145_v28 }
 0x11b   :  { %v152_v30 = vmul.f32 %v199_v27, %v146_v29 }
 0x11d   :  { %153 = vadd.xlane.f32.xlu0 %v152_v30 }
 0x190   :  { %v154_v33 = vpop.xlane.xlu0 %153 }
 0x191   :  { %v159_v34 = vadd.f32 %v200_v32, %v154_v33 }
 0x193   :  { %165 = vperm.xlu0 %196, %v159_v34  }
 0x205   :  { %v166_v37 = vpop.permute.xlu0 %165 }
 0x206   :  { %v168_v38 = vsel %vm162_vm1, %v166_v37, %v146_v29 }
 0x207   :  { %169 = vst [vmem:[#allocation9] sm:$0xff] %v168_v38 }
 0x208   :  { %180 = dma.vmem_to_hbm [thread:$0]  %s176_s22, 128, %s178_s24, [#allocation5]  }
 0x209   :  { %301 = dma.done.wait [#allocation5], 128  }
 0x20a   :  { %302 = vsyncadd [#allocation5], 4294967168 }
 0x20b   :  { %185 = vsyncpa [#allocation4], 1 }
 0x20c   :  { %186 = vsyncpa [#allocation7], 1 }
 0x20d   :  { %187 = vsyncpa [#allocation5], 1 }

</bundles_post_ra>
